<compile_context>
chip_gen: v7x
topology: tpu7x:2x2x1
jax: 0.10.0
libtpu: 0.0.40
codegen_flags: <defaults>
</compile_context>

<pallas_src>
import math

import jax
import jax.numpy as jnp
from jax.experimental import pallas as pl
from jax.experimental.pallas import tpu as pltpu


def _round_up(x: int, m: int) -> int:
    return ((x + m - 1) // m) * m


# Conservative budgets so the kernel fits every generation's *default* scoped
# VMEM (v5e: 16 MiB) without setting vmem_limit_bytes.
_WEIGHT_VMEM_BUDGET = 8 << 20    # resident weights (Pallas double-buffers them)
_ACT_VMEM_BUDGET = 12 << 20      # streamed blocks + f32 intermediates


def _mlp_body(num_layers: int):
    """Kernel body: (x_ref, w0, b0, ..., wL-1, bL-1, out_ref)."""

    def body(x_ref, *refs):
        out_ref = refs[-1]
        wb = refs[:-1]
        h = x_ref[...]                                   # (TR, row_in)
        for li in range(num_layers):
            w = wb[2 * li][...]                          # resident, pre-cast
            b = wb[2 * li + 1][...]                      # (1, row_out), f32
            # MXU matmul with f32 accumulation; bias add / ReLU on the VPU.
            h = jnp.dot(h.astype(w.dtype), w,
                        preferred_element_type=jnp.float32) + b
            if li < num_layers - 1:
                h = jnp.maximum(h, 0.0)
        out_ref[...] = h.astype(out_ref.dtype)

    return body


def _pick_fold(dims, P, itemsize):
    """Number of points packed per row so streamed blocks are lane-dense."""

    def fold_for(ds):
        g = 1
        for d in ds:
            g = math.lcm(g, 128 // math.gcd(d, 128))
        return g

    # Prefer folding every layer width to a multiple of 128; otherwise at
    # least the output (the masked-store lever); otherwise no folding.
    for g in (fold_for(dims), fold_for(dims[-1:]), 1):
        if g > 128 or P % g != 0:
            continue
        w_bytes = sum((g * di) * (g * do) * itemsize
                      for di, do in zip(dims[:-1], dims[1:]))
        if 2 * w_bytes <= _WEIGHT_VMEM_BUDGET:           # x2: double-buffered
            return g
    return 1


def mlp_kernel_forward(diff, params, *, tile_points=None,
                       compute_dtype=None, out_dtype=None):
    """Pallas forward of MLPKernel.

    diff          : (m, n1, n2, dx)
    params        : list of (W, b) with W: (d_in, d_out), b: (d_out,) / (1, d_out)
    compute_dtype : dtype of x / weights fed to the MXU (accumulation is always
                    f32).  bf16 halves HBM traffic on this memory-bound op.
    """
    m, n1, n2, dx = diff.shape
    dims = [dx] + [w.shape[1] for (w, _) in params]
    dout = dims[-1]
    compute_dtype = jnp.dtype(diff.dtype if compute_dtype is None else compute_dtype)
    out_dtype = jnp.dtype(diff.dtype if out_dtype is None else out_dtype)

    P = m * n1 * n2
    g = _pick_fold(dims, P, compute_dtype.itemsize)

    # ---- one-time wrapper prep: free reshapes + hoisted casts --------------
    x = diff.astype(compute_dtype).reshape(P // g, g * dx)
    eye = jnp.eye(g, dtype=compute_dtype) if g > 1 else None

    flat_params, wb_specs = [], []
    for (w, b) in params:
        w = jnp.asarray(w, compute_dtype)
        b = jnp.asarray(b, jnp.float32).reshape(1, -1)
        if g > 1:
            w = jnp.kron(eye, w)          # block-diagonal: g independent points
            b = jnp.tile(b, (1, g))
        flat_params += [w, b]
        # Constant index_map -> fetched into VMEM once, reused by every step.
        wb_specs += [pl.BlockSpec(w.shape, lambda i: (0, 0)),
                     pl.BlockSpec(b.shape, lambda i: (0, 0))]

    R = P // g                             # rows of the (folded) point stream
    row_in, row_out = g * dx, g * dout
    widths = [g * d for d in dims]

    # ---- tile sizing --------------------------------------------------------
    sub = 16 if min(compute_dtype.itemsize, out_dtype.itemsize) < 4 else 8
    stream_bytes = row_in * compute_dtype.itemsize + row_out * out_dtype.itemsize
    if tile_points is not None:
        tr = max(1, tile_points // g)
    else:
        tr = (1 << 20) // max(stream_bytes, 1)       # ~1 MiB streamed per step
    act_bytes = 2 * stream_bytes + 8 * sum(widths)   # dbl-buffered I/O + f32 tmps
    tr = min(tr,
             pl.cdiv(R, 8),                          # >=8 steps: feed both v7x TCs
             _ACT_VMEM_BUDGET // max(act_bytes, 1),
             8192, max(R, 1))
    tr = _round_up(max(tr, 1), sub)
    grid = (pl.cdiv(R, tr),)                         # no pad: edge block is masked

    out = pl.pallas_call(
        _mlp_body(len(params)),
        out_shape=jax.ShapeDtypeStruct((R, row_out), out_dtype),
        grid=grid,
        in_specs=[pl.BlockSpec((tr, row_in), lambda i: (i, 0))] + wb_specs,
        out_specs=pl.BlockSpec((tr, row_out), lambda i: (i, 0)),
        compiler_params=pltpu.CompilerParams(
            dimension_semantics=("parallel",)),      # shard tiles across TCs
        # TODO(synk): for very wide MLPs on v7x, single-buffer the resident
        # weights (pipeline_mode=pl.Buffered(1)) and set vmem_limit_bytes.
    )(x, *flat_params)

    # (R, g*dout) is byte-identical to (P, dout) row-major -> free reshape.
    return out.reshape(m, n1, n2, dout)


def init_mlp_params(key, dims, dtype=jnp.float32):
    """PyTorch nn.Linear-style deterministic init: U(-1/sqrt(fan_in), +...)."""
    params = []
    for d_in, d_out in zip(dims[:-1], dims[1:]):
        key, kw, kb = jax.random.split(key, 3)
        bound = float(d_in) ** -0.5
        w = jax.random.uniform(kw, (d_in, d_out), dtype, -bound, bound)
        b = jax.random.uniform(kb, (1, d_out), dtype, -bound, bound)
        params.append((w, b))
    return params


def mlp_reference(diff, params):
    """Pure-JAX reference mirroring the torch MLP forward."""
    h = diff
    for i, (w, b) in enumerate(params):
        h = jnp.dot(h, w, precision="highest") + jnp.reshape(b, (-1,))
        if i < len(params) - 1:
            h = jax.nn.relu(h)
    return h


if __name__ == "__main__":
    key = jax.random.PRNGKey(0)
    kx, kp, kx2 = jax.random.split(key, 3)

    # Small shapes consistent with diff: [m, n1, n2, dx] -> out: [m, n1, n2, dout]
    m, n1, n2, dx = 2, 16, 32, 4
    width, dout = 32, 16

    diff = jax.random.normal(kx, (m, n1, n2, dx), dtype=jnp.float32)
    params = init_mlp_params(kp, [dx, width, width, dout], jnp.float32)
    ref = mlp_reference(diff, params)

    # 1) Default path: lane-folded f32 (lane-dense output, multi-step grid).
    out = mlp_kernel_forward(diff, params)
    jax.block_until_ready(out)
    assert out.shape == (m, n1, n2, dout)
    assert jnp.allclose(out, ref, atol=1e-4, rtol=1e-4)

    # 2) Point count not divisible by the fold factor -> plain tiled path with
    #    a masked (non-divisible) edge block, no pad / slice.
    diff2 = jax.random.normal(kx2, (2, 7, 9, dx), dtype=jnp.float32)
    out2 = mlp_kernel_forward(diff2, params)
    jax.block_until_ready(out2)
    assert jnp.allclose(out2, mlp_reference(diff2, params), atol=1e-4, rtol=1e-4)

    # 3) bf16 I/O + bf16 MXU operands (f32 accumulation) -> ~2x less HBM traffic.
    #    Looser tolerance: bf16 cannot meet 1e-4 against the f32 reference.
    out3 = mlp_kernel_forward(diff, params, compute_dtype=jnp.bfloat16,
                              out_dtype=jnp.bfloat16)
    jax.block_until_ready(out3)
    assert jnp.allclose(out3.astype(jnp.float32), ref, atol=5e-2, rtol=5e-2)

    print("KERNEL_OK")
</pallas_src>

<mosaic_0001>
module attributes {stable_mosaic.version = 11 : i64} {
  func.func @body(%arg0: i32, %arg1: memref<16x32xf32, #tpu.memory_space<vmem>>, %arg2: memref<32x256xf32, #tpu.memory_space<vmem>>, %arg3: memref<1x256xf32, #tpu.memory_space<vmem>>, %arg4: memref<256x256xf32, #tpu.memory_space<vmem>>, %arg5: memref<1x256xf32, #tpu.memory_space<vmem>>, %arg6: memref<256x128xf32, #tpu.memory_space<vmem>>, %arg7: memref<1x128xf32, #tpu.memory_space<vmem>>, %arg8: memref<16x128xf32, #tpu.memory_space<vmem>>) attributes {dimension_semantics = [#tpu.dimension_semantics<parallel>], iteration_bounds = array<i64: 8>, scalar_prefetch = 0 : i64, scratch_operands = 0 : i64, tpu.core_type = #tpu.core_type<tc>, window_params = [{transform_indices = @transform_0, window_bounds = array<i64: 16, 32>}, {pipeline_mode = #tpu.pipeline_mode<synchronous>, transform_indices = @transform_1, window_bounds = array<i64: 32, 256>}, {pipeline_mode = #tpu.pipeline_mode<synchronous>, transform_indices = @transform_2, window_bounds = array<i64: 1, 256>}, {pipeline_mode = #tpu.pipeline_mode<synchronous>, transform_indices = @transform_3, window_bounds = array<i64: 256, 256>}, {pipeline_mode = #tpu.pipeline_mode<synchronous>, transform_indices = @transform_4, window_bounds = array<i64: 1, 256>}, {pipeline_mode = #tpu.pipeline_mode<synchronous>, transform_indices = @transform_5, window_bounds = array<i64: 256, 128>}, {pipeline_mode = #tpu.pipeline_mode<synchronous>, transform_indices = @transform_6, window_bounds = array<i64: 1, 128>}, {transform_indices = @transform_7, window_bounds = array<i64: 16, 128>}]} {
    %c0 = arith.constant 0 : index
    %c0_0 = arith.constant 0 : index
    %0 = vector.load %arg1[%c0, %c0_0] : memref<16x32xf32, #tpu.memory_space<vmem>>, vector<16x32xf32>
    %c0_1 = arith.constant 0 : index
    %c0_2 = arith.constant 0 : index
    %1 = vector.load %arg2[%c0_1, %c0_2] : memref<32x256xf32, #tpu.memory_space<vmem>>, vector<32x256xf32>
    %c0_3 = arith.constant 0 : index
    %c0_4 = arith.constant 0 : index
    %2 = vector.load %arg3[%c0_3, %c0_4] : memref<1x256xf32, #tpu.memory_space<vmem>>, vector<1x256xf32>
    %cst = arith.constant dense<0.000000e+00> : vector<16x256xf32>
    %3 = tpu.matmul %0, %1, %cst {dimension_numbers = #tpu.dot_dimension_numbers<[1], [0], [0], [1], [0, 0, 1, 1], [], []>} : vector<16x32xf32>, vector<32x256xf32>, vector<16x256xf32> -> vector<16x256xf32>
    %4 = vector.broadcast %2 : vector<1x256xf32> to vector<16x256xf32>
    %5 = arith.addf %3, %4 : vector<16x256xf32>
    %cst_5 = arith.constant 0.000000e+00 : f32
    %6 = vector.broadcast %cst_5 : f32 to vector<16x256xf32>
    %7 = arith.maximumf %5, %6 : vector<16x256xf32>
    %c0_6 = arith.constant 0 : index
    %c0_7 = arith.constant 0 : index
    %8 = vector.load %arg4[%c0_6, %c0_7] : memref<256x256xf32, #tpu.memory_space<vmem>>, vector<256x256xf32>
    %c0_8 = arith.constant 0 : index
    %c0_9 = arith.constant 0 : index
    %9 = vector.load %arg5[%c0_8, %c0_9] : memref<1x256xf32, #tpu.memory_space<vmem>>, vector<1x256xf32>
    %cst_10 = arith.constant dense<0.000000e+00> : vector<16x256xf32>
    %10 = tpu.matmul %7, %8, %cst_10 {dimension_numbers = #tpu.dot_dimension_numbers<[1], [0], [0], [1], [0, 0, 1, 1], [], []>} : vector<16x256xf32>, vector<256x256xf32>, vector<16x256xf32> -> vector<16x256xf32>
    %11 = vector.broadcast %9 : vector<1x256xf32> to vector<16x256xf32>
    %12 = arith.addf %10, %11 : vector<16x256xf32>
    %cst_11 = arith.constant 0.000000e+00 : f32
    %13 = vector.broadcast %cst_11 : f32 to vector<16x256xf32>
    %14 = arith.maximumf %12, %13 : vector<16x256xf32>
    %c0_12 = arith.constant 0 : index
    %c0_13 = arith.constant 0 : index
    %15 = vector.load %arg6[%c0_12, %c0_13] : memref<256x128xf32, #tpu.memory_space<vmem>>, vector<256x128xf32>
    %c0_14 = arith.constant 0 : index
    %c0_15 = arith.constant 0 : index
    %16 = vector.load %arg7[%c0_14, %c0_15] : memref<1x128xf32, #tpu.memory_space<vmem>>, vector<1x128xf32>
    %cst_16 = arith.constant dense<0.000000e+00> : vector<16x128xf32>
    %17 = tpu.matmul %14, %15, %cst_16 {dimension_numbers = #tpu.dot_dimension_numbers<[1], [0], [0], [1], [0, 0, 1, 1], [], []>} : vector<16x256xf32>, vector<256x128xf32>, vector<16x128xf32> -> vector<16x128xf32>
    %18 = vector.broadcast %16 : vector<1x128xf32> to vector<16x128xf32>
    %19 = arith.addf %17, %18 : vector<16x128xf32>
    %c0_17 = arith.constant 0 : index
    %c0_18 = arith.constant 0 : index
    %20 = vector.load %arg8[%c0_17, %c0_18] : memref<16x128xf32, #tpu.memory_space<vmem>>, vector<16x128xf32>
    tpu.vector_store %arg8[%c0_17, %c0_18], %19 {strides = array<i32>} : memref<16x128xf32, #tpu.memory_space<vmem>>, vector<16x128xf32>,
    return
  }
  func.func @transform_0(%arg0: i32) -> (i32, i32) {
    %c0_i32 = arith.constant 0 : i32
    %c0_i32_0 = arith.constant 0 : i32
    return %arg0, %c0_i32 : i32, i32
  }
  func.func @transform_1(%arg0: i32) -> (i32, i32) {
    %c0_i32 = arith.constant 0 : i32
    %c0_i32_0 = arith.constant 0 : i32
    %c0_i32_1 = arith.constant 0 : i32
    return %c0_i32, %c0_i32_0 : i32, i32
  }
  func.func @transform_2(%arg0: i32) -> (i32, i32) {
    %c0_i32 = arith.constant 0 : i32
    %c0_i32_0 = arith.constant 0 : i32
    %c0_i32_1 = arith.constant 0 : i32
    return %c0_i32, %c0_i32_0 : i32, i32
  }
  func.func @transform_3(%arg0: i32) -> (i32, i32) {
    %c0_i32 = arith.constant 0 : i32
    %c0_i32_0 = arith.constant 0 : i32
    %c0_i32_1 = arith.constant 0 : i32
    return %c0_i32, %c0_i32_0 : i32, i32
  }
  func.func @transform_4(%arg0: i32) -> (i32, i32) {
    %c0_i32 = arith.constant 0 : i32
    %c0_i32_0 = arith.constant 0 : i32
    %c0_i32_1 = arith.constant 0 : i32
    return %c0_i32, %c0_i32_0 : i32, i32
  }
  func.func @transform_5(%arg0: i32) -> (i32, i32) {
    %c0_i32 = arith.constant 0 : i32
    %c0_i32_0 = arith.constant 0 : i32
    %c0_i32_1 = arith.constant 0 : i32
    return %c0_i32, %c0_i32_0 : i32, i32
  }
  func.func @transform_6(%arg0: i32) -> (i32, i32) {
    %c0_i32 = arith.constant 0 : i32
    %c0_i32_0 = arith.constant 0 : i32
    %c0_i32_1 = arith.constant 0 : i32
    return %c0_i32, %c0_i32_0 : i32, i32
  }
  func.func @transform_7(%arg0: i32) -> (i32, i32) {
    %c0_i32 = arith.constant 0 : i32
    %c0_i32_0 = arith.constant 0 : i32
    return %arg0, %c0_i32 : i32, i32
  }
}

</mosaic_0001>

<bundles_post_ra>
// kernel: tpu_custom_call.1
= control target key start
LH: loop header
LB: loop body
LE: loop exit
PB: predicated region body
PF: predicated region fallthrough
CT: control target
= control target key end

     0   :  { %12 = vsyncpa [#allocation3], 0  ;;  %s1407_s0 = inlined_call_operand.vmem [shape: f32[128,32], index: 0, kind: input, shape index: {}]   ;;  %s1408_s1 = inlined_call_operand.vmem [shape: f32[32,256], index: 1, kind: input, shape index: {}]   ;;  %s1409_s2 = inlined_call_operand.vmem [shape: f32[1,256], index: 2, kind: input, shape index: {}]   ;;  %s1410_s3 = inlined_call_operand.hbm [shape: f32[256,256], index: 3, kind: input, shape index: {}]   ;;  %s1411_s4 = inlined_call_operand.vmem [shape: f32[1,256], index: 4, kind: input, shape index: {}]   ;;  %s1412_s5 = inlined_call_operand.hbm [shape: f32[256,128], index: 5, kind: input, shape index: {}]   ;;  %s1413_s6 = inlined_call_operand.vmem [shape: f32[1,128], index: 6, kind: input, shape index: {}]   ;;  %s1414_s7 = inlined_call_operand.hbm [shape: f32[128,128], index: 7, kind: output, shape index: {}]  }
   0x1   :  { %13 = vsyncpa [#allocation6], 0 }
   0x2   :  { %14 = vsyncpa [#allocation4], 0 }
   0x3   :  { %16 = vsyncpa [#allocation4 + $0x1], 0  ;;  %s1198_s24 = smov 0   ;;  %s1200_s25 = smov 0  }
   0x4   :  { %s1202_s26 = smov 0   ;;  %s1204_s27 = smov 0  }
   0x5 LB: > { %s1219_s28 = sadd.s32 4294967295, %s1146_s27   ;;  %s791_s29 = sadd.s32 4294967294, %s1146_s27   ;;  %s1146_s27 = sphi %s1204_s27, %s1434_s27   ;;  %s1142_s26 = sphi %s1202_s26, %s1433_s26   ;;  %s1138_s25 = sphi %s1200_s25, %s1432_s25   ;;  %s1134_s24 = sphi %s1198_s24, %s1431_s24  }
   0x6   : > { %s1223_s30 = sadd.s32 1, %s1146_s27   ;;  %s181_s8 = sadd.s32 1, %s1142_s26 }
   0x7   : > { %s178_s9 = ssub.s32 %s1146_s27, %s1223_s30  ;;  %p191_p0 = scmp.ne.s32.totalorder %s1142_s26, %s1138_s25 }
   0x8   : > { %p179_p1 = scmp.eq.s32.totalorder %s178_s9, 0  ;;  %p192_p2 = scmp.eq.s32.totalorder %s1219_s28, 7 }
   0x9   : > { %p197_p3 = scmp.ne.s32.totalorder %s1138_s25, %s1134_s24  ;;  %p198_p4 = scmp.eq.s32.totalorder %s791_s29, 7 }
   0xa   : > { %s1234_s10 = scalar_select %p179_p1, %s1142_s26, %s181_s8  }
   0xb   : > { %p1236_p5 = por %p192_p2, %p191_p0  ;;  %p1240_p6 = por %p198_p4, %p197_p3 }
   0xc   : > { %1418 = sst [smem:[#allocation11_spill]] %s1234_s10  ;;  %p792_p7 = scmp.ge.s32.totalorder %s1146_s27, 1 }
   0xd   : > { %s1419_s11 = scalar_select %p1236_p5, 1, 0 }
   0xe   : > { %s1420_s12 = scalar_select %p1240_p6, 1, 0 }
   0xf   : > { %p205_p8 = scmp.lt.s32.totalorder %s1146_s27, 9  ;;  %p1415_p9 = scmp.eq.s32.totalorder %s1219_s28, 0 }
  0x10   : > { %s1148_s14 = smov [#allocation2]   ;;  %s1149_s17 = smov [#allocation5]  }
  0x11   : > { %p1247_p10 = pnand %p792_p7, %p205_p8  ;;  %s223_s15 = sshll.u32 %s1148_s14, 4  ;;  %s224_s15 = int_to_ptr.vmem [resolvable:$true] %s223_s15 }
  0x12   : > { %s239_s18 = sshll.u32 %s1149_s17, 4  ;;  %s1020_s21 = scalar_lea.hbm %s1410_s3, 8192  ;;  %s1259_s18 = int_to_ptr.vmem [resolvable:$true] %s239_s18 }
  0x13   : > { %s1421_s13 = scalar_select %p1247_p10, 1, 0 }
  0x14   : > { %p963_p11 = pneg %p1247_p10  ;;  %p1021_p13 = scmp.ne.s32.totalorder %s1410_s3, %s1020_s21 }
  0x15   : > { %p1027_p3 = scmp.lt.u32.totalorder %s1020_s21, %s1410_s3 }
  0x16   : > { %p1255_p12 = pnand %p1415_p9, %p963_p11 }
  0x18   : > { %p1022_p0 = pneg %p1255_p12 }
  0x1a   : > { %p1023_p1 = pnand %p1022_p0, %p1021_p13 }
  0x1c   : > { %p1024_p2 = pneg %p1023_p1 }
  0x1e   : > { %p1029_p4 = pnand %p1027_p3, %p1024_p2 }
  0x20   : > { %1032 = shalt.err (!%p1029_p4)
}
  0x21   : > { %s1033_s9 = scalar_lea.vmem %s224_s15, 8192  ;;  %p1041_p9 = scmp.lt.s32.totalorder %s224_s15, %s224_s15 }
  0x22   : > { %p1034_p7 = scmp.ne.s32.totalorder %s224_s15, %s1033_s9  ;;  %p1042_p6 = scmp.lt.s32.totalorder %s1033_s9, %s1033_s9 }
  0x24   : > { %p1036_p8 = pnand %p1034_p7, %p1022_p0  ;;  %p1043_p5 = por %p1042_p6, %p1041_p9 }
  0x26   : > { %p1037_p11 = pneg %p1036_p8 }
  0x28   : > { %p1044_p10 = pnand %p1043_p5, %p1037_p11 }
  0x2a   : > { %1047 = shalt.err (!%p1044_p10)
}
  0x2b   : > { %s1150_s14 = smov 256   ;;  %s1151_s17 = smov 16  }
  0x2c   : > { %966 = dma.hbm_to_vmem [thread:$0]  (!%p1255_p12), %s1410_s3, 8192, %s224_s15, [#allocation3], %s1150_s14, %s1150_s14, %s1151_s17  }
  0x2d   : > { %s1048_s23 = scalar_lea.hbm %s1412_s5, 4096 }
  0x2e   : > { %p1049_p13 = scmp.ne.s32.totalorder %s1412_s5, %s1048_s23  ;;  %p1055_p9 = scmp.lt.u32.totalorder %s1048_s23, %s1412_s5 }
  0x30   : > { %p1051_p5 = pnand %p1049_p13, %p1022_p0 }
  0x32   : > { %p1052_p6 = pneg %p1051_p5 }
  0x34   : > { %p1057_p10 = pnand %p1055_p9, %p1052_p6 }
  0x36   : > { %1060 = shalt.err (!%p1057_p10)
}
  0x37   : > { %s1061_s15 = scalar_lea.vmem %s1259_s18, 4096  ;;  %p1069_p4 = scmp.lt.s32.totalorder %s1259_s18, %s1259_s18 }
  0x38   : > { %p1062_p1 = scmp.ne.s32.totalorder %s1259_s18, %s1061_s15  ;;  %p1070_p7 = scmp.lt.s32.totalorder %s1061_s15, %s1061_s15 }
  0x3a   : > { %p1064_p2 = pnand %p1062_p1, %p1022_p0  ;;  %p1071_p8 = por %p1070_p7, %p1069_p4 }
  0x3c   : > { %p1065_p3 = pneg %p1064_p2 }
  0x3e   : > { %p1072_p11 = pnand %p1071_p8, %p1065_p3 }
  0x40   : > { %1075 = shalt.err (!%p1072_p11)
}
  0x41   : > { %s1152_s10 = smov 128   ;;  %s1153_s14 = smov 8  }
  0x42   : > { %969 = dma.hbm_to_vmem [thread:$0]  (!%p1255_p12), %s1412_s5, 4096, %s1259_s18, [#allocation6], %s1152_s10, %s1152_s10, %s1153_s14  }
  0x43   : > { %p1423_p13 = scmp.ne.s32.totalorder %s1421_s13, 0 }
  0x44   : > { %p1424_p0 = scmp.eq.s32.totalorder (!%p1423_p13), %s1219_s28, 0 }
  0x45   : > { %267 = sbr.rel (%p1423_p13) target bundleno = 763 (0x2fb), region = 48 }
  0x4c   : > { %1121 = dma.done.wait (%p1424_p0), [#allocation3], 8192   ;;  %p1425_p5 = pmov %p1424_p0 }
  0x4d   : > { %p1426_p6 = pmov %p1424_p0 }
  0x4e   : > { %1123 = vsyncadd (%p1425_p5), [#allocation3], 4294959104 }
  0x4f   : > { %1125 = dma.done.wait (%p1426_p6), [#allocation6], 4096   ;;  %p1427_p9 = pmov %p1424_p0 }
  0x50   : > { %s800_s16 = sshll.u32 %s1219_s28, 1  ;;  %v1154_v0 = vmov 0.0   ;;  %v313_v1 = vld [vmem:[%s1408_s1 + $0x8] sm:$0xff]  ;;  %v315_v2 = vld [vmem:[%s1408_s1 + $0x18] sm:$0xff]  ;;  %v312_v3 = vld [vmem:[%s1408_s1] sm:$0xff]  ;;  %vm332_vm0 = vcmask 261120  }
  0x51   : > { %1127 = vsyncadd (%p1427_p9), [#allocation6], 4294963200  ;;  %403 = vmatprep.mubr.f32.mxu0 %v1154_v0  ;;  %p304_p12 = scmp.lt.s32.totalorder %s800_s16, 15  ;;  %v849_v4 = vpack.c.bf16 %v315_v2, %v313_v1  ;;  %v314_v5 = vld [vmem:[%s1408_s1 + $0x10] sm:$0xff]  ;;  %v317_v6 = vld [vmem:[%s1408_s1 + $0x28] sm:$0xff]  ;;  %s300_s15 = sand.u32 1, %s1138_s25  }
  0x52   : > { %v319_v7 = vld [vmem:[%s1408_s1 + $0x38] sm:$0xff]  ;;  %v851_v8 = vpack.c.bf16 %v314_v5, %v312_v3  ;;  %v316_v10 = vld [vmem:[%s1408_s1 + $0x20] sm:$0xff]  ;;  %v318_v11 = vld [vmem:[%s1408_s1 + $0x30] sm:$0xff]  ;;  %s799_s10 = sshll.u32 %s300_s15, 4  ;;  %s810_s18 = sshll.u32 %s1219_s28, 8 }
  0x53   : > { %s1436_s16 = smov (!%p304_p12, %s800_s16), 15  ;;  %v853_v9 = vpack.c.bf16 %v319_v7, %v317_v6  ;;  %850 = vmatprep.subr.bf16.mxu0 %v849_v4  ;;  %v421_v12 = vld [vmem:[#allocation2 + $0x8] sm:$0xff]  ;;  %v423_v13 = vld [vmem:[#allocation2 + $0x18] sm:$0xff]  ;;  %v855_v14 = vpack.c.bf16 %v318_v11, %v316_v10  ;;  %v420_v16 = vld [vmem:[#allocation2] sm:$0xff]  ;;  %s302_s19 = scalar_lea.vmem [#allocation7], %s799_s10 }
  0x54   : > { %s801_s20 = sshll.u32 %s1436_s16, 3  ;;  %852 = vmatpush1.bf16.msra.mxu0 %v851_v8  ;;  %v857_v15 = vpack.c.bf16 %v423_v13, %v421_v12  ;;  %v422_v17 = vld [vmem:[#allocation2 + $0x10] sm:$0xff]  ;;  %v425_v18 = vld [vmem:[#allocation2 + $0x28] sm:$0xff]  ;;  %v427_v20 = vld [vmem:[#allocation2 + $0x38] sm:$0xff]  ;;  %s707_s13 = sshll.u32 %s302_s19, 4  ;;  %s1359_s13 = int_to_ptr.vmem [resolvable:$true] %s707_s13 }
  0x55   : > { %854 = vmatprep.subr.bf16.mxu0 %v853_v9  ;;  %s307_s23 = scalar_lea.vmem %s1407_s0, %s801_s20  ;;  %v859_v19 = vpack.c.bf16 %v422_v17, %v420_v16  ;;  %v424_v21 = vld [vmem:[#allocation2 + $0x20] sm:$0xff]  ;;  %v426_v22 = vld [vmem:[#allocation2 + $0x30] sm:$0xff]  ;;  %v861_v23 = vpack.c.bf16 %v427_v20, %v425_v18  ;;  %v429_v24 = vld [vmem:[#allocation2 + $0x48] sm:$0xff]  ;;  %s1364_s22 = scalar_lea.hbm %s1414_s7, %s810_s18 }
  0x56   : > { %858 = vmatprep.subr.bf16.mxu1 %v857_v15  ;;  %v431_v25 = vld [vmem:[#allocation2 + $0x58] sm:$0xff]  ;;  %v863_v26 = vpack.c.bf16 %v426_v22, %v424_v21  ;;  %v310_v27 = vld [vmem:[%s307_s23] sm:$0xff]  ;;  %v430_v30 = vld [vmem:[#allocation2 + $0x50] sm:$0xff]  ;;  %s1076_s16 = scalar_lea.vmem %s1359_s13, 256  ;;  %p1428_p1 = scmp.ne.s32.totalorder %s1419_s11, 0 }
  0x57   : > { %860 = vmatpush1.bf16.msra.mxu1 %v859_v19  ;;  %v865_v28 = vpack.c.bf16 %v431_v25, %v429_v24  ;;  %v428_v29 = vld [vmem:[#allocation2 + $0x40] sm:$0xff]  ;;  %v433_v31 = vld [vmem:[#allocation2 + $0x68] sm:$0xff]  ;;  %v435_v32 = vld [vmem:[#allocation2 + $0x78] sm:$0xff]  ;;  %p1077_p10 = scmp.ne.s32.totalorder %s1359_s13, %s1076_s16  ;;  %s1155_s28 = smov [#allocation7]  }
  0x58   : > { %856 = vmatpush1.bf16.msra.mxu0 %v855_v14  ;;  %862 = vmatprep.subr.bf16.mxu1 %v861_v23  ;;  %v867_v33 = vpack.c.bf16 %v430_v30, %v428_v29  ;;  %v311_v34 = vld [vmem:[%s307_s23 + $0x8] sm:$0xff]  ;;  %v869_v35 = vpack.c.bf16 %v435_v32, %v433_v31  ;;  %v432_v36 = vld [vmem:[#allocation2 + $0x60] sm:$0xff]  ;;  %v434_v37 = vld [vmem:[#allocation2 + $0x70] sm:$0xff]  ;;  %s1366_s23 = scalar_lea.sflag [#allocation4], %s300_s15  ;;  %s1080_s29 = sshll.u32 %s1155_s28, 4  ;;  %s1081_s29 = int_to_ptr.vmem [resolvable:$false] %s1080_s29 }
  0x59   : > { %v437_v38 = vld [vmem:[#allocation2 + $0x88] sm:$0xff]  ;;  %v439_v39 = vld [vmem:[#allocation2 + $0x98] sm:$0xff]  ;;  %v871_v40 = vpack.c.bf16 %v434_v37, %v432_v36  ;;  %v436_v42 = vld [vmem:[#allocation2 + $0x80] sm:$0xff]  ;;  %p1078_p2 = pnand %p1077_p10, %p1428_p1  ;;  %s1082_s8 = scalar_lea.vmem %s1081_s29, 512 }
  0x5a   : > { %v873_v41 = vpack.c.bf16 %v439_v39, %v437_v38  ;;  %v438_v43 = vld [vmem:[#allocation2 + $0x90] sm:$0xff]  ;;  %v441_v44 = vld [vmem:[#allocation2 + $0xa8] sm:$0xff]  ;;  %v443_v45 = vld [vmem:[#allocation2 + $0xb8] sm:$0xff]  ;;  %p1083_p4 = scmp.lt.s32.totalorder %s1359_s13, %s1081_s29  ;;  %p1084_p7 = scmp.lt.s32.totalorder %s1082_s8, %s1076_s16 }
  0x5b   : > { %802 = vmatmul.mubr.msk.f32.vlgmr.msra.gmra.mrb[0].mxu0 %vm332_vm0, %v310_v27  ;;  %864 = vmatpush1.bf16.msra.mxu1 %v863_v26  ;;  %v875_v46 = vpack.c.bf16 %v438_v43, %v436_v42  ;;  %v877_v47 = vpack.c.bf16 %v443_v45, %v441_v44  ;;  %v440_v48 = vld [vmem:[#allocation2 + $0xa0] sm:$0xff]  ;;  %v442_v49 = vld [vmem:[#allocation2 + $0xb0] sm:$0xff]  ;;  %v445_v50 = vld [vmem:[#allocation2 + $0xc8] sm:$0xff]  ;;  %p1079_p3 = pneg %p1078_p2 }
  0x5c   : > { %409 = vmatprep.mubr.f32.mxu0 %v1154_v0  ;;  %866 = vmatprep.subr.bf16.mxu1 %v865_v28  ;;  %v447_v51 = vld [vmem:[#allocation2 + $0xd8] sm:$0xff]  ;;  %v879_v52 = vpack.c.bf16 %v442_v49, %v440_v48  ;;  %v444_v54 = vld [vmem:[#allocation2 + $0xc0] sm:$0xff]  ;;  %v446_v55 = vld [vmem:[#allocation2 + $0xd0] sm:$0xff]  ;;  %p1085_p8 = por %p1084_p7, %p1083_p4 }
  0x5d   : > { %v881_v53 = vpack.c.bf16 %v447_v51, %v445_v50  ;;  %v449_v56 = vld [vmem:[#allocation2 + $0xe8] sm:$0xff]  ;;  %v451_v57 = vld [vmem:[#allocation2 + $0xf8] sm:$0xff]  ;;  %v883_v58 = vpack.c.bf16 %v446_v55, %v444_v54  ;;  %v448_v60 = vld [vmem:[#allocation2 + $0xe0] sm:$0xff] }
  0x5e   : > { %v885_v59 = vpack.c.bf16 %v451_v57, %v449_v56  ;;  %v450_v61 = vld [vmem:[#allocation2 + $0xf0] sm:$0xff]  ;;  %v453_v62 = vld [vmem:[#allocation2 + $0x108] sm:$0xff]  ;;  %v455_v63 = vld [vmem:[#allocation2 + $0x118] sm:$0xff]  ;;  %p1086_p11 = pnand %p1085_p8, %p1079_p3 }
  0x5f   : > { %803 = vmatmul.mubr.msk.f32.gmra.mrb[2].mxu0 %vm332_vm0, %v311_v34  ;;  %868 = vmatpush1.bf16.msra.mxu1 %v867_v33  ;;  %v887_v0 = vpack.c.bf16 %v450_v61, %v448_v60  ;;  %v889_v1 = vpack.c.bf16 %v455_v63, %v453_v62  ;;  %v452_v2 = vld [vmem:[#allocation2 + $0x100] sm:$0xff]  ;;  %v454_v3 = vld [vmem:[#allocation2 + $0x110] sm:$0xff]  ;;  %v457_v4 = vld [vmem:[#allocation2 + $0x128] sm:$0xff] }
  0x60   : > { %870 = vmatprep.subr.bf16.mxu1 %v869_v35  ;;  %v459_v5 = vld [vmem:[#allocation2 + $0x138] sm:$0xff]  ;;  %v891_v6 = vpack.c.bf16 %v454_v3, %v452_v2  ;;  %v456_v8 = vld [vmem:[#allocation2 + $0x120] sm:$0xff]  ;;  %v458_v9 = vld [vmem:[#allocation2 + $0x130] sm:$0xff] }
  0x61   : > { %v893_v7 = vpack.c.bf16 %v459_v5, %v457_v4  ;;  %v461_v10 = vld [vmem:[#allocation2 + $0x148] sm:$0xff]  ;;  %v463_v11 = vld [vmem:[#allocation2 + $0x158] sm:$0xff]  ;;  %v895_v12 = vpack.c.bf16 %v458_v9, %v456_v8  ;;  %v460_v14 = vld [vmem:[#allocation2 + $0x140] sm:$0xff] }
  0x62   : > { %v897_v13 = vpack.c.bf16 %v463_v11, %v461_v10  ;;  %v462_v15 = vld [vmem:[#allocation2 + $0x150] sm:$0xff]  ;;  %v465_v16 = vld [vmem:[#allocation2 + $0x168] sm:$0xff]  ;;  %v467_v17 = vld [vmem:[#allocation2 + $0x178] sm:$0xff] }
  0x63   : > { %872 = vmatpush1.bf16.msra.mxu1 %v871_v40  ;;  %v899_v18 = vpack.c.bf16 %v462_v15, %v460_v14  ;;  %v901_v19 = vpack.c.bf16 %v467_v17, %v465_v16  ;;  %v464_v20 = vld [vmem:[#allocation2 + $0x160] sm:$0xff]  ;;  %v466_v21 = vld [vmem:[#allocation2 + $0x170] sm:$0xff]  ;;  %v469_v22 = vld [vmem:[#allocation2 + $0x188] sm:$0xff] }
  0x64   : > { %874 = vmatprep.subr.bf16.mxu1 %v873_v41  ;;  %v471_v23 = vld [vmem:[#allocation2 + $0x198] sm:$0xff]  ;;  %v903_v24 = vpack.c.bf16 %v466_v21, %v464_v20  ;;  %v468_v26 = vld [vmem:[#allocation2 + $0x180] sm:$0xff]  ;;  %v470_v27 = vld [vmem:[#allocation2 + $0x190] sm:$0xff] }
  0x65   : > { %v905_v25 = vpack.c.bf16 %v471_v23, %v469_v22  ;;  %v473_v28 = vld [vmem:[#allocation2 + $0x1a8] sm:$0xff]  ;;  %v475_v29 = vld [vmem:[#allocation2 + $0x1b8] sm:$0xff]  ;;  %v907_v30 = vpack.c.bf16 %v470_v27, %v468_v26  ;;  %v472_v32 = vld [vmem:[#allocation2 + $0x1a0] sm:$0xff]  ;;  %v322_v22 = vlaneseq }
  0x66   : > { %v909_v31 = vpack.c.bf16 %v475_v29, %v473_v28  ;;  %v474_v33 = vld [vmem:[#allocation2 + $0x1b0] sm:$0xff]  ;;  %v477_v34 = vld [vmem:[#allocation2 + $0x1c8] sm:$0xff]  ;;  %v479_v35 = vld [vmem:[#allocation2 + $0x1d8] sm:$0xff] }
  0x67   : > { %876 = vmatpush1.bf16.msra.mxu1 %v875_v46  ;;  %v911_v36 = vpack.c.bf16 %v474_v33, %v472_v32  ;;  %v913_v37 = vpack.c.bf16 %v479_v35, %v477_v34  ;;  %v476_v38 = vld [vmem:[#allocation2 + $0x1c0] sm:$0xff]  ;;  %v478_v39 = vld [vmem:[#allocation2 + $0x1d0] sm:$0xff]  ;;  %v481_v41 = vld [vmem:[#allocation2 + $0x1e8] sm:$0xff]  ;;  %v323_v23 = vshrl.u32 %v322_v22, 7 }
  0x68   : > { %878 = vmatprep.subr.bf16.mxu1 %v877_v47  ;;  %v915_v40 = vpack.c.bf16 %v478_v39, %v476_v38  ;;  %v483_v42 = vld [vmem:[#allocation2 + $0x1f8] sm:$0xff]  ;;  %v480_v44 = vld [vmem:[#allocation2 + $0x1e0] sm:$0xff]  ;;  %v482_v45 = vld [vmem:[#allocation2 + $0x1f0] sm:$0xff] }
  0x69   : > { %v917_v43 = vpack.c.bf16 %v483_v42, %v481_v41  ;;  %v919_v46 = vpack.c.bf16 %v482_v45, %v480_v44  ;;  %v593_v47 = vld [vmem:[#allocation5 + $0x80] sm:$0xff]  ;;  %v594_v48 = vld [vmem:[#allocation5 + $0x88] sm:$0xff]  ;;  %v579_v56 = vld [vmem:[#allocation5 + $0x10] sm:$0xff]  ;;  %v328_v26 = vsub.s32 1, %v323_v23 }
  0x6a   : > { %v577_v49 = vld [vmem:[#allocation5] sm:$0xff]  ;;  %v921_v50 = vpack.c.bf16 %v594_v48, %v593_v47  ;;  %v578_v51 = vld [vmem:[#allocation5 + $0x8] sm:$0xff]  ;;  %v580_v57 = vld [vmem:[#allocation5 + $0x18] sm:$0xff] }
  0x6b   : > { %880 = vmatpush1.bf16.msra.mxu1 %v879_v52  ;;  %v595_v52 = vld [vmem:[#allocation5 + $0x90] sm:$0xff]  ;;  %v923_v54 = vpack.c.bf16 %v578_v51, %v577_v49  ;;  %v927_v60 = vpack.c.bf16 %v580_v57, %v579_v56  ;;  %v581_v62 = vld [vmem:[#allocation5 + $0x20] sm:$0xff]  ;;  %v582_v63 = vld [vmem:[#allocation5 + $0x28] sm:$0xff] }
  0x6c   : > { %882 = vmatprep.subr.bf16.mxu1 %v881_v53  ;;  %v596_v53 = vld [vmem:[#allocation5 + $0x98] sm:$0xff]  ;;  %922 = vmatprep.subr.bf16.mxu0 %v921_v50  ;;  %v931_v2 = vpack.c.bf16 %v582_v63, %v581_v62  ;;  %v583_v4 = vld [vmem:[#allocation5 + $0x30] sm:$0xff]  ;;  %v585_v10 = vld [vmem:[#allocation5 + $0x40] sm:$0xff] }
  0x6d   : > { %v925_v55 = vpack.c.bf16 %v596_v53, %v595_v52  ;;  %924 = vmatpush3.bf16.msra.mxu0 %v923_v54  ;;  %v584_v5 = vld [vmem:[#allocation5 + $0x38] sm:$0xff]  ;;  %v586_v11 = vld [vmem:[#allocation5 + $0x48] sm:$0xff]  ;;  %v587_v16 = vld [vmem:[#allocation5 + $0x50] sm:$0xff] }
  0x6e   : > { %v935_v8 = vpack.c.bf16 %v584_v5, %v583_v4  ;;  %v939_v14 = vpack.c.bf16 %v586_v11, %v585_v10  ;;  %v588_v17 = vld [vmem:[#allocation5 + $0x58] sm:$0xff]  ;;  %v589_v41 = vld [vmem:[#allocation5 + $0x60] sm:$0xff]  ;;  %v590_v42 = vld [vmem:[#allocation5 + $0x68] sm:$0xff] }
  0x6f   : > { %884 = vmatpush1.bf16.msra.mxu1 %v883_v58  ;;  %v597_v58 = vld [vmem:[#allocation5 + $0xa0] sm:$0xff]  ;;  %926 = vmatprep.subr.bf16.mxu0 %v925_v55  ;;  %v943_v20 = vpack.c.bf16 %v588_v17, %v587_v16  ;;  %v607_v44 = vld [vmem:[#allocation5 + $0xf0] sm:$0xff]  ;;  %v608_v45 = vld [vmem:[#allocation5 + $0xf8] sm:$0xff] }
  0x70   : > { %886 = vmatprep.subr.bf16.mxu1 %v885_v59  ;;  %v598_v59 = vld [vmem:[#allocation5 + $0xa8] sm:$0xff]  ;;  %v591_v47 = vld [vmem:[#allocation5 + $0x70] sm:$0xff]  ;;  %v592_v48 = vld [vmem:[#allocation5 + $0x78] sm:$0xff] }
  0x71   : > { %v929_v61 = vpack.c.bf16 %v598_v59, %v597_v58  ;;  %928 = vmatpush3.bf16.msra.mxu0 %v927_v60  ;;  %v951_v49 = vpack.c.bf16 %v592_v48, %v591_v47  ;;  %v484_v50 = vld [vmem:[%s1411_s4] sm:$0x3] }
  0x72   : > { %v493_v52 = vrot.slane %v484_v50, %v328_v26 }
  0x73   : > { %888 = vmatpush1.bf16.msra.mxu1 %v887_v0  ;;  %v599_v0 = vld [vmem:[#allocation5 + $0xb0] sm:$0xff]  ;;  %930 = vmatprep.subr.bf16.mxu0 %v929_v61 }
  0x74   : > { %890 = vmatprep.subr.bf16.mxu1 %v889_v1  ;;  %v600_v1 = vld [vmem:[#allocation5 + $0xb8] sm:$0xff] }
  0x75   : > { %v933_v3 = vpack.c.bf16 %v600_v1, %v599_v0  ;;  %932 = vmatpush3.bf16.msra.mxu0 %v931_v2  ;;  %v804_v2 = vld [vmem:[%s1413_s6] ss:$0 sm:$0xff] }
  0x77   : > { %892 = vmatpush1.bf16.msra.mxu1 %v891_v6  ;;  %v601_v6 = vld [vmem:[#allocation5 + $0xc0] sm:$0xff]  ;;  %934 = vmatprep.subr.bf16.mxu0 %v933_v3 }
  0x78   : > { %894 = vmatprep.subr.bf16.mxu1 %v893_v7  ;;  %v602_v7 = vld [vmem:[#allocation5 + $0xc8] sm:$0xff] }
  0x79   : > { %v937_v9 = vpack.c.bf16 %v602_v7, %v601_v6  ;;  %936 = vmatpush3.bf16.msra.mxu0 %v935_v8 }
  0x7b   : > { %896 = vmatpush1.bf16.msra.mxu1 %v895_v12  ;;  %v603_v12 = vld [vmem:[#allocation5 + $0xd0] sm:$0xff]  ;;  %938 = vmatprep.subr.bf16.mxu0 %v937_v9 }
  0x7c   : > { %898 = vmatprep.subr.bf16.mxu1 %v897_v13  ;;  %v604_v13 = vld [vmem:[#allocation5 + $0xd8] sm:$0xff] }
  0x7d   : > { %v941_v15 = vpack.c.bf16 %v604_v13, %v603_v12  ;;  %940 = vmatpush3.bf16.msra.mxu0 %v939_v14 }
  0x7f   : > { %900 = vmatpush1.bf16.msra.mxu1 %v899_v18  ;;  %v605_v18 = vld [vmem:[#allocation5 + $0xe0] sm:$0xff]  ;;  %942 = vmatprep.subr.bf16.mxu0 %v941_v15 }
  0x80   : > { %902 = vmatprep.subr.bf16.mxu1 %v901_v19  ;;  %v606_v19 = vld [vmem:[#allocation5 + $0xe8] sm:$0xff] }
  0x81   : > { %v945_v21 = vpack.c.bf16 %v606_v19, %v605_v18  ;;  %944 = vmatpush3.bf16.msra.mxu0 %v943_v20 }
  0x83   : > { %904 = vmatpush1.bf16.msra.mxu1 %v903_v24  ;;  %946 = vmatprep.subr.bf16.mxu0 %v945_v21  ;;  %v324_v24 = vsub.s32 0, %v323_v23 }
  0x84   : > { %906 = vmatprep.subr.bf16.mxu1 %v905_v25  ;;  %v320_v25 = vld [vmem:[%s1409_s2] sm:$0x3] }
  0x85   : > { %v325_v27 = vrot.slane %v320_v25, %v324_v24  ;;  %v329_v28 = vrot.slane %v320_v25, %v328_v26  ;;  %v489_v51 = vrot.slane %v484_v50, %v324_v24 }
  0x87   : > { %908 = vmatpush1.bf16.msra.mxu1 %v907_v30 }
  0x88   : > { %910 = vmatprep.subr.bf16.mxu1 %v909_v31 }
  0x8b   : > { %912 = vmatpush1.bf16.msra.mxu1 %v911_v36 }
  0x8c   : > { %914 = vmatprep.subr.bf16.mxu1 %v913_v37 }
  0x8f   : > { %916 = vmatpush1.bf16.msra.mxu1 %v915_v40 }
  0x90   : > { %918 = vmatprep.subr.bf16.mxu1 %v917_v43  ;;  %v947_v43 = vpack.c.bf16 %v590_v42, %v589_v41 }
  0x92   : > { %948 = vmatpush3.bf16.msra.mxu0 %v947_v43 }
  0x93   : > { %920 = vmatpush1.bf16.msra.mxu1 %v919_v46  ;;  %v949_v46 = vpack.c.bf16 %v608_v45, %v607_v44 }
  0x95   : > { %950 = vmatprep.subr.bf16.mxu0 %v949_v46 }
  0x96   : > { %952 = vmatpush3.bf16.msra.mxu0 %v951_v49 }
 0x12e   : > { %v405_v29 = vpop.f32.mrb[0].mxu0 }
 0x12f   : > { %v406_v30 = vadd.f32 %v405_v29, %v325_v27  ;;  %v407_v31 = vpop.f32.mrb[1].mxu0 }
 0x130   : > { %v408_v32 = vadd.f32 %v407_v31, %v329_v28 }
 0x131   : > { %v416_v35 = vmax.f32 %v406_v30, 0.0 }
 0x132   : > { %v411_v33 = vpop.f32.mrb[2].mxu0  ;;  %v417_v34 = vmax.f32 %v408_v32, 0.0 }
 0x133   : > { %v412_v36 = vadd.f32 %v411_v33, %v325_v27  ;;  %v413_v37 = vpop.f32.mrb[3].mxu0 }
 0x134   : > { %v414_v38 = vadd.f32 %v413_v37, %v329_v28  ;;  %560 = vmatprep.mubr.f32.mxu1 %v417_v34 }
 0x135   : > { %561 = vmatmul.mubr.f32.vlgmr.msra.gmra.mrb[0].mxu1 %v416_v35  ;;  %v418_v40 = vmax.f32 %v412_v36, 0.0 }
 0x136   : > { %v419_v39 = vmax.f32 %v414_v38, 0.0 }
 0x138   : > { %566 = vmatprep.mubr.f32.mxu1 %v419_v39 }
 0x139   : > { %567 = vmatmul.mubr.f32.gmra.mrb[2].mxu1 %v418_v40 }
 0x208   : > { %v562_v53 = vpop.f32.mrb[0].mxu1 }
 0x209   : > { %v563_v54 = vadd.f32 %v562_v53, %v489_v51  ;;  %v564_v55 = vpop.f32.mrb[1].mxu1 }
 0x20a   : > { %v565_v56 = vadd.f32 %v564_v55, %v493_v52 }
 0x20b   : > { %v573_v59 = vmax.f32 %v563_v54, 0.0 }
 0x20c   : > { %v574_v57 = vmax.f32 %v565_v56, 0.0  ;;  %v568_v58 = vpop.f32.mrb[2].mxu1 }
 0x20d   : > { %v569_v60 = vadd.f32 %v568_v58, %v489_v51  ;;  %v570_v61 = vpop.f32.mrb[3].mxu1 }
 0x20e   : > { %v571_v62 = vadd.f32 %v570_v61, %v493_v52  ;;  %680 = vmatprep.mubr.f32.mxu0 %v574_v57 }
 0x20f   : > { %681 = vmatmul.mubr.f32.vlgmr.msra.gmra.mrb[4].mxu0 %v573_v59  ;;  %v575_v0 = vmax.f32 %v569_v60, 0.0 }
 0x210   : > { %v576_v63 = vmax.f32 %v571_v62, 0.0 }
 0x212   : > { %685 = vmatprep.mubr.f32.mxu0 %v576_v63 }
 0x213   : > { %686 = vmatmul.mubr.f32.gmra.mrb[6].mxu0 %v575_v0 }
 0x2e2   : > { %v843_v1 = vpop.f32.mrb[4].mxu0 }
 0x2e3   : > { %v844_v3 = vpop.f32.mrb[5].mxu0 }
 0x2e4   : > { %v845_v4 = vadd.f32 %v844_v3, %v843_v1 }
 0x2e6   : > { %v683_v5 = vadd.f32 %v845_v4, %v804_v2  ;;  %v846_v6 = vpop.f32.mrb[6].mxu0 }
 0x2e7   : > { %v847_v7 = vpop.f32.mrb[7].mxu0 }
 0x2e8   : > { %691 = vst [vmem:[%s302_s19] sm:$0xff] %v683_v5  ;;  %v848_v8 = vadd.f32 %v847_v7, %v846_v6 }
 0x2ea   : > { %v688_v9 = vadd.f32 %v848_v8, %v804_v2 }
 0x2ec   : > { %692 = vst [vmem:[%s302_s19 + $0x8] sm:$0xff] %v688_v9 }
 0x2ed   : > { %1089 = shalt.err (!%p1086_p11)
}
 0x2ee   : > { %s1090_s9 = scalar_lea.hbm %s1364_s22, 256  ;;  %s1094_s14 = scalar_lea.hbm %s1414_s7, 2048 }
 0x2ef   : > { %p1091_p13 = scmp.ne.s32.totalorder %s1364_s22, %s1090_s9  ;;  %p1095_p6 = scmp.lt.u32.totalorder %s1364_s22, %s1414_s7 }
 0x2f0   : > { %p1096_p9 = scmp.lt.u32.totalorder %s1094_s14, %s1090_s9  ;;  %p1098_p10 = scmp.lt.u32.totalorder %s1090_s9, %s1364_s22 }
 0x2f1   : > { %p1092_p0 = pnand %p1091_p13, %p1428_p1 }
 0x2f2   : > { %p1097_p12 = por %p1096_p9, %p1095_p6 }
 0x2f3   : > { %p1093_p5 = pneg %p1092_p0 }
 0x2f4   : > { %p1099_p2 = por %p1098_p10, %p1097_p12 }
 0x2f6   : > { %p1100_p3 = pnand %p1099_p2, %p1093_p5 }
 0x2f8   : > { %1103 = shalt.err (!%p1100_p3)
}
 0x2f9   : > { %s1156_s18 = smov 128   ;;  %s1157_s20 = smov 8  }
 0x2fa   : > { %961 = dma.vmem_to_hbm [thread:$0]  (%p1428_p1), %s1359_s13, 256, %s1364_s22, %s1366_s23, %s1156_s18, %s1156_s18, %s1157_s20  }
 0x2fb PF: > { %p978_p4 = scmp.ge.s32.totalorder %s1146_s27, 2  ;;  %s722_s21 = sand.u32 1, %s1134_s24  }
 0x2fc   : > { %p1429_p7 = scmp.ne.s32.totalorder %s1420_s12, 0  ;;  %s723_s16 = scalar_lea.sflag [#allocation4], %s722_s21 }
 0x2fe   : > { %p971_p8 = pnand %p978_p4, %p1429_p7 }
 0x300   : > { %1129 = dma.done.wait (!%p971_p8), %s723_s16, 256  }
 0x301   : > { %1131 = vsyncadd (!%p971_p8), %s723_s16, 4294967040  ;;  %s1430_s28 = sld [smem:[#allocation11_spill]]  ;;  %p19_p11 = scmp.ge.s32.totalorder %s1223_s30, 10  }
 0x302   : > { %s1431_s24 = smov %s1138_s25  ;;  %s1432_s25 = smov %s1142_s26 }
 0x303   : > { %s1434_s27 = smov %s1223_s30  ;;  %21 = sbr.rel (!%p19_p11) target bundleno = 5 (0x5), region = 92 }
 0x307   : > { %s1433_s26 = smov %s1430_s28 }
 0x30a   :  { %728 = vsyncpa [#allocation3], 1 }
 0x30b   :  { %730 = vsyncpa [#allocation3 + $0x1], 1 }
 0x30c   :  { %731 = vsyncpa [#allocation6], 1 }
 0x30d   :  { %732 = vsyncpa [#allocation4], 1 }
 0x30e   :  { %734 = vsyncpa [#allocation4 + $0x1], 1 }

</bundles_post_ra>
